<compile_context>
chip_gen: v7x
topology: tpu7x:2x2x1
jax: 0.10.0
libtpu: 0.0.40
codegen_flags: <defaults>
</compile_context>

<pallas_src>
import math

import jax
import jax.numpy as jnp
from jax.experimental import pallas as pl
from jax.experimental.pallas import tpu as pltpu


def _round_up(a, b):
    return ((a + b - 1) // b) * b


def _gcnii_kernel(adj_ref, xm_ref, h0m_ref, o_ref, acc_ref):
    """out[i] = relu( sum_k adj[i,k] @ xm[k] + h0m[i] ), f32 accumulation."""
    k = pl.program_id(1)

    @pl.when(k == 0)
    def _():
        acc_ref[...] = jnp.zeros_like(acc_ref)

    acc_ref[...] += jnp.dot(adj_ref[...], xm_ref[...],
                            preferred_element_type=jnp.float32)

    @pl.when(k == pl.num_programs(1) - 1)
    def _():
        res = acc_ref[...] + h0m_ref[...].astype(jnp.float32)
        o_ref[...] = jnp.maximum(res, 0.0).astype(o_ref.dtype)


def prepare_adj(adj, dtype=jnp.bfloat16):
    """Cast the dense adjacency ONCE and reuse it across all GCNII layers.

    The kernel is HBM-bound on the adj stream; a per-layer cast would add a
    full extra N^2 read+write pass on top of the kernel's own adj read.
    """
    return adj.astype(dtype)


def gcnii_forward(x, h0, adj, beta, alpha, ident, weight, *, tile_m=None,
                  out_dtype=jnp.float32):
    """GCNII forward. x, h0: (N, F); adj: (N, N) (pre-cast via prepare_adj);
    weight, ident: (F, F)."""
    n, f = x.shape
    assert adj.shape == (n, n)
    assert h0.shape == (n, f)
    assert weight.shape == (f, f) and ident.shape == (f, f)

    # ---- fold mapping / alpha / beta into the operands (tiny, wrapper-side) ----
    mapping = (1.0 - beta) * ident + beta * weight        # (F, F)
    xm = (1.0 - alpha) * (x @ mapping)                    # (N, F)
    h0m = alpha * (h0 @ mapping)                          # (N, F)

    # Dominant stream dtype follows adj (cast hoisted to the caller).
    stream_dtype = adj.dtype
    bytes_in = jnp.dtype(stream_dtype).itemsize
    bytes_h0 = 2                                          # h0m streamed as bf16
    bytes_out = jnp.dtype(out_dtype).itemsize

    # ---- lane-dense feature padding (multiple of 128) ----
    f_pad = _round_up(f, 128)

    # ---- generation-aware VMEM budget ----
    try:
        vmem_cap = pltpu.get_tpu_info().vmem_capacity_bytes
    except Exception:                                     # conservative fallback
        vmem_cap = 64 << 20
    budget = int(0.70 * vmem_cap)       # ~44 MiB on v7x, ~90 MiB on v5e/v6e

    def _vmem_est(tm, tk, kt):
        xm_bufs = 1 if kt == 1 else 2   # resident xm single-buffered when grid-invariant
        return (2 * tm * tk * bytes_in              # adj row tile (double-buffered)
                + xm_bufs * tk * f_pad * bytes_in   # xm
                + 2 * tm * f_pad * bytes_h0         # h0m tile
                + 2 * tm * f_pad * bytes_out        # out tile
                + tm * f_pad * 4)                   # f32 accumulator scratch

    # ---- row (M) tiling: big tiles, but >=2 grid steps so both v7x TCs run ----
    row_align = 16 if bytes_in == 2 else 8
    if tile_m is None:
        tile_m = min(512, _round_up(max(-(-n // 2), row_align), row_align))
    else:
        tile_m = max(_round_up(tile_m, row_align), row_align)

    # ---- K tiling: keep xm fully resident if it fits, else split K ----
    tile_k, grid_k = n, 1               # full-K: adj block last dim == full array dim
    while _vmem_est(tile_m, tile_k, 1) > budget and tile_m > 2 * row_align:
        tile_m = _round_up(tile_m // 2, row_align)
    if _vmem_est(tile_m, tile_k, 1) > budget:
        # Resident xm no longer fits (v7x's 64 MiB hits this first): split K
        # across an "arbitrary" grid axis with an f32 VMEM accumulator.
        tile_k = 4096
        while _vmem_est(tile_m, tile_k, 2) > budget and tile_k > 128:
            tile_k //= 2
        grid_k = -(-n // tile_k)

    n_m = _round_up(n, tile_m)
    n_k = tile_k * grid_k
    grid_m = n_m // tile_m

    # ---- pad operands (no-ops when shapes already align) ----
    xm = xm.astype(stream_dtype)
    h0m = h0m.astype(jnp.bfloat16)
    if (n_m, n_k) != adj.shape:
        adj = jnp.pad(adj, ((0, n_m - n), (0, n_k - n)))
    if xm.shape != (n_k, f_pad):
        xm = jnp.pad(xm, ((0, n_k - n), (0, f_pad - f)))
    if h0m.shape != (n_m, f_pad):
        h0m = jnp.pad(h0m, ((0, n_m - n), (0, f_pad - f)))

    cost = pl.CostEstimate(
        flops=2 * n_m * n_k * f_pad,
        transcendentals=0,
        bytes_accessed=(n_m * n_k * bytes_in + n_k * f_pad * bytes_in
                        + n_m * f_pad * bytes_h0 + n_m * f_pad * bytes_out))

    vmem_limit = int(min(max(_vmem_est(tile_m, tile_k, grid_k) + (8 << 20),
                             32 << 20),
                         int(0.85 * vmem_cap)))

    def _build(single_buffer_xm):
        xm_kwargs = (dict(pipeline_mode=pl.Buffered(1))
                     if single_buffer_xm else {})
        return pl.pallas_call(
            _gcnii_kernel,
            out_shape=jax.ShapeDtypeStruct((n_m, f_pad), out_dtype),
            grid=(grid_m, grid_k),
            in_specs=[
                # adj: (tile_m, tile_k) row/col tile — the dominant HBM stream
                pl.BlockSpec((tile_m, tile_k), lambda i, k: (i, k)),
                # xm: (tile_k, f_pad); grid-invariant (fetched once) when grid_k==1
                pl.BlockSpec((tile_k, f_pad), lambda i, k: (k, 0), **xm_kwargs),
                # h0m: matching row tile (read only at the last K step)
                pl.BlockSpec((tile_m, f_pad), lambda i, k: (i, 0)),
            ],
            out_specs=pl.BlockSpec((tile_m, f_pad), lambda i, k: (i, 0)),
            scratch_shapes=[pltpu.VMEM((tile_m, f_pad), jnp.float32)],
            compiler_params=pltpu.CompilerParams(
                dimension_semantics=("parallel", "arbitrary"),
                vmem_limit_bytes=vmem_limit),
            cost_estimate=cost,
        )

    try:
        out_pad = _build(single_buffer_xm=(grid_k == 1))(adj, xm, h0m)
    except Exception:
        # Fallback for jax versions without BlockSpec pipeline_mode support.
        out_pad = _build(single_buffer_xm=False)(adj, xm, h0m)

    if (n_m, f_pad) != (n, f):
        out_pad = out_pad[:n, :f]
    # TODO(synk): when stacking GCNII layers, keep activations lane-padded and
    # in bf16 between layers (slice/cast only once at the very end).
    return out_pad


def xavier_uniform(key, shape, gain):
    fan_in, fan_out = shape
    bound = gain * math.sqrt(6.0 / (fan_in + fan_out))
    return jax.random.uniform(key, shape, jnp.float32, -bound, bound)


if __name__ == "__main__":
    # Small deterministic problem: N=128 nodes, hidden=32 features.
    N, F = 128, 32
    key = jax.random.PRNGKey(0)
    k_w, k_x, k_h0, k_adj = jax.random.split(key, 4)

    # Parameter: weight (input_feature, output_feature) == (F, F),
    # xavier_uniform_ with gain=1.2 (deterministic, no checkpoint).
    weight = xavier_uniform(k_w, (F, F), gain=1.2)

    x = jax.random.normal(k_x, (N, F), jnp.float32)
    h0 = jax.random.normal(k_h0, (N, F), jnp.float32)

    # Symmetric, row-normalized-ish dense adjacency.
    a = jax.random.uniform(k_adj, (N, N), jnp.float32)
    adj = (a + a.T) / (2.0 * N)

    ident = jnp.eye(F, dtype=jnp.float32)
    alpha = 0.1
    beta = 0.5

    # Cast the adjacency ONCE and reuse it (GCNII stacks many layers on the
    # same adj; per-layer casts would dominate the HBM traffic).
    adj_bf16 = prepare_adj(adj, jnp.bfloat16)

    out = gcnii_forward(x, h0, adj_bf16, beta, alpha, ident, weight)
    out = jax.block_until_ready(out)

    # Reference check in plain f32 JAX (bf16 streams -> loosened tolerance).
    res_ref = (1.0 - alpha) * (adj @ x) + alpha * h0
    mapping_ref = (1.0 - beta) * ident + beta * weight
    ref = jnp.maximum(res_ref @ mapping_ref, 0.0)
    assert out.shape == ref.shape
    assert jnp.allclose(out, ref, atol=2e-2, rtol=2e-2), "mismatch vs reference"

    print("KERNEL_OK")
</pallas_src>

<mosaic_0001>
module attributes {stable_mosaic.version = 11 : i64} {
  func.func @_gcnii_kernel(%arg0: i32, %arg1: i32, %arg2: memref<64x128xbf16, #tpu.memory_space<vmem>>, %arg3: memref<128x128xbf16, #tpu.memory_space<vmem>>, %arg4: memref<64x128xbf16, #tpu.memory_space<vmem>>, %arg5: memref<64x128xf32, #tpu.memory_space<vmem>>, %arg6: memref<64x128xf32, #tpu.memory_space<vmem>>) attributes {dimension_semantics = [#tpu.dimension_semantics<parallel>, #tpu.dimension_semantics<arbitrary>], iteration_bounds = array<i64: 2, 1>, scalar_prefetch = 0 : i64, scratch_operands = 1 : i64, tpu.core_type = #tpu.core_type<tc>, window_params = [{transform_indices = @transform_0, window_bounds = array<i64: 64, 128>}, {pipeline_mode = #tpu.pipeline_mode<synchronous>, transform_indices = @transform_1, window_bounds = array<i64: 128, 128>}, {transform_indices = @transform_2, window_bounds = array<i64: 64, 128>}, {transform_indices = @transform_3, window_bounds = array<i64: 64, 128>}]} {
    %c0_i32 = arith.constant 0 : i32
    %0 = arith.cmpi eq, %arg1, %c0_i32 : i32
    %1 = arith.extui %0 : i1 to i32
    %c0_i32_0 = arith.constant 0 : i32
    %2 = arith.cmpi ne, %1, %c0_i32_0 : i32
    scf.if %2 {
      %cst_10 = arith.constant 0.000000e+00 : f32
      %12 = vector.broadcast %cst_10 : f32 to vector<64x128xf32>
      %c0_11 = arith.constant 0 : index
      %c0_12 = arith.constant 0 : index
      %13 = vector.load %arg6[%c0_11, %c0_12] : memref<64x128xf32, #tpu.memory_space<vmem>>, vector<64x128xf32>
      tpu.vector_store %arg6[%c0_11, %c0_12], %12 {strides = array<i32>} : memref<64x128xf32, #tpu.memory_space<vmem>>, vector<64x128xf32>,
    } else {
    }
    %c0 = arith.constant 0 : index
    %c0_1 = arith.constant 0 : index
    %3 = vector.load %arg6[%c0, %c0_1] : memref<64x128xf32, #tpu.memory_space<vmem>>, vector<64x128xf32>
    %c0_2 = arith.constant 0 : index
    %c0_3 = arith.constant 0 : index
    %4 = vector.load %arg2[%c0_2, %c0_3] : memref<64x128xbf16, #tpu.memory_space<vmem>>, vector<64x128xbf16>
    %c0_4 = arith.constant 0 : index
    %c0_5 = arith.constant 0 : index
    %5 = vector.load %arg3[%c0_4, %c0_5] : memref<128x128xbf16, #tpu.memory_space<vmem>>, vector<128x128xbf16>
    %cst = arith.constant dense<0.000000e+00> : vector<64x128xf32>
    %6 = tpu.matmul %4, %5, %cst {dimension_numbers = #tpu.dot_dimension_numbers<[1], [0], [0], [1], [0, 0, 1, 1], [], []>} : vector<64x128xbf16>, vector<128x128xbf16>, vector<64x128xf32> -> vector<64x128xf32>
    %7 = arith.addf %3, %6 : vector<64x128xf32>
    %c0_6 = arith.constant 0 : index
    %c0_7 = arith.constant 0 : index
    %8 = vector.load %arg6[%c0_6, %c0_7] : memref<64x128xf32, #tpu.memory_space<vmem>>, vector<64x128xf32>
    tpu.vector_store %arg6[%c0_6, %c0_7], %7 {strides = array<i32>} : memref<64x128xf32, #tpu.memory_space<vmem>>, vector<64x128xf32>,
    %c0_i32_8 = arith.constant 0 : i32
    %9 = arith.cmpi eq, %arg1, %c0_i32_8 : i32
    %10 = arith.extui %9 : i1 to i32
    %c0_i32_9 = arith.constant 0 : i32
    %11 = arith.cmpi ne, %10, %c0_i32_9 : i32
    scf.if %11 {
      %c0_10 = arith.constant 0 : index
      %c0_11 = arith.constant 0 : index
      %12 = vector.load %arg6[%c0_10, %c0_11] : memref<64x128xf32, #tpu.memory_space<vmem>>, vector<64x128xf32>
      %c0_12 = arith.constant 0 : index
      %c0_13 = arith.constant 0 : index
      %13 = vector.load %arg4[%c0_12, %c0_13] : memref<64x128xbf16, #tpu.memory_space<vmem>>, vector<64x128xbf16>
      %14 = arith.extf %13 : vector<64x128xbf16> to vector<64x128xf32>
      %15 = arith.addf %12, %14 : vector<64x128xf32>
      %cst_14 = arith.constant 0.000000e+00 : f32
      %16 = vector.broadcast %cst_14 : f32 to vector<64x128xf32>
      %17 = arith.maximumf %15, %16 : vector<64x128xf32>
      %c0_15 = arith.constant 0 : index
      %c0_16 = arith.constant 0 : index
      %18 = vector.load %arg5[%c0_15, %c0_16] : memref<64x128xf32, #tpu.memory_space<vmem>>, vector<64x128xf32>
      tpu.vector_store %arg5[%c0_15, %c0_16], %17 {strides = array<i32>} : memref<64x128xf32, #tpu.memory_space<vmem>>, vector<64x128xf32>,
    } else {
    }
    return
  }
  func.func @transform_0(%arg0: i32, %arg1: i32) -> (i32, i32) {
    %c0_i32 = arith.constant 0 : i32
    return %arg0, %arg1 : i32, i32
  }
  func.func @transform_1(%arg0: i32, %arg1: i32) -> (i32, i32) {
    %c0_i32 = arith.constant 0 : i32
    %c0_i32_0 = arith.constant 0 : i32
    return %arg1, %c0_i32 : i32, i32
  }
  func.func @transform_2(%arg0: i32, %arg1: i32) -> (i32, i32) {
    %c0_i32 = arith.constant 0 : i32
    %c0_i32_0 = arith.constant 0 : i32
    return %arg0, %c0_i32 : i32, i32
  }
  func.func @transform_3(%arg0: i32, %arg1: i32) -> (i32, i32) {
    %c0_i32 = arith.constant 0 : i32
    %c0_i32_0 = arith.constant 0 : i32
    return %arg0, %c0_i32 : i32, i32
  }
}

module attributes {stable_mosaic.version = 11 : i64} {
  func.func @_gcnii_kernel(%arg0: i32, %arg1: i32, %arg2: memref<64x128xbf16, #tpu.memory_space<vmem>>, %arg3: memref<128x128xbf16, #tpu.memory_space<vmem>>, %arg4: memref<64x128xbf16, #tpu.memory_space<vmem>>, %arg5: memref<64x128xf32, #tpu.memory_space<vmem>>, %arg6: memref<64x128xf32, #tpu.memory_space<vmem>>) attributes {dimension_semantics = [#tpu.dimension_semantics<parallel>, #tpu.dimension_semantics<arbitrary>], iteration_bounds = array<i64: 2, 1>, scalar_prefetch = 0 : i64, scratch_operands = 1 : i64, tpu.core_type = #tpu.core_type<tc>, window_params = [{transform_indices = @transform_0, window_bounds = array<i64: 64, 128>}, {transform_indices = @transform_1, window_bounds = array<i64: 128, 128>}, {transform_indices = @transform_2, window_bounds = array<i64: 64, 128>}, {transform_indices = @transform_3, window_bounds = array<i64: 64, 128>}]} {
    %c0_i32 = arith.constant 0 : i32
    %0 = arith.cmpi eq, %arg1, %c0_i32 : i32
    %1 = arith.extui %0 : i1 to i32
    %c0_i32_0 = arith.constant 0 : i32
    %2 = arith.cmpi ne, %1, %c0_i32_0 : i32
    scf.if %2 {
      %cst_10 = arith.constant 0.000000e+00 : f32
      %12 = vector.broadcast %cst_10 : f32 to vector<64x128xf32>
      %c0_11 = arith.constant 0 : index
      %c0_12 = arith.constant 0 : index
      %13 = vector.load %arg6[%c0_11, %c0_12] : memref<64x128xf32, #tpu.memory_space<vmem>>, vector<64x128xf32>
      tpu.vector_store %arg6[%c0_11, %c0_12], %12 {strides = array<i32>} : memref<64x128xf32, #tpu.memory_space<vmem>>, vector<64x128xf32>,
    } else {
    }
    %c0 = arith.constant 0 : index
    %c0_1 = arith.constant 0 : index
    %3 = vector.load %arg6[%c0, %c0_1] : memref<64x128xf32, #tpu.memory_space<vmem>>, vector<64x128xf32>
    %c0_2 = arith.constant 0 : index
    %c0_3 = arith.constant 0 : index
    %4 = vector.load %arg2[%c0_2, %c0_3] : memref<64x128xbf16, #tpu.memory_space<vmem>>, vector<64x128xbf16>
    %c0_4 = arith.constant 0 : index
    %c0_5 = arith.constant 0 : index
    %5 = vector.load %arg3[%c0_4, %c0_5] : memref<128x128xbf16, #tpu.memory_space<vmem>>, vector<128x128xbf16>
    %cst = arith.constant dense<0.000000e+00> : vector<64x128xf32>
    %6 = tpu.matmul %4, %5, %cst {dimension_numbers = #tpu.dot_dimension_numbers<[1], [0], [0], [1], [0, 0, 1, 1], [], []>} : vector<64x128xbf16>, vector<128x128xbf16>, vector<64x128xf32> -> vector<64x128xf32>
    %7 = arith.addf %3, %6 : vector<64x128xf32>
    %c0_6 = arith.constant 0 : index
    %c0_7 = arith.constant 0 : index
    %8 = vector.load %arg6[%c0_6, %c0_7] : memref<64x128xf32, #tpu.memory_space<vmem>>, vector<64x128xf32>
    tpu.vector_store %arg6[%c0_6, %c0_7], %7 {strides = array<i32>} : memref<64x128xf32, #tpu.memory_space<vmem>>, vector<64x128xf32>,
    %c0_i32_8 = arith.constant 0 : i32
    %9 = arith.cmpi eq, %arg1, %c0_i32_8 : i32
    %10 = arith.extui %9 : i1 to i32
    %c0_i32_9 = arith.constant 0 : i32
    %11 = arith.cmpi ne, %10, %c0_i32_9 : i32
    scf.if %11 {
      %c0_10 = arith.constant 0 : index
      %c0_11 = arith.constant 0 : index
      %12 = vector.load %arg6[%c0_10, %c0_11] : memref<64x128xf32, #tpu.memory_space<vmem>>, vector<64x128xf32>
      %c0_12 = arith.constant 0 : index
      %c0_13 = arith.constant 0 : index
      %13 = vector.load %arg4[%c0_12, %c0_13] : memref<64x128xbf16, #tpu.memory_space<vmem>>, vector<64x128xbf16>
      %14 = arith.extf %13 : vector<64x128xbf16> to vector<64x128xf32>
      %15 = arith.addf %12, %14 : vector<64x128xf32>
      %cst_14 = arith.constant 0.000000e+00 : f32
      %16 = vector.broadcast %cst_14 : f32 to vector<64x128xf32>
      %17 = arith.maximumf %15, %16 : vector<64x128xf32>
      %c0_15 = arith.constant 0 : index
      %c0_16 = arith.constant 0 : index
      %18 = vector.load %arg5[%c0_15, %c0_16] : memref<64x128xf32, #tpu.memory_space<vmem>>, vector<64x128xf32>
      tpu.vector_store %arg5[%c0_15, %c0_16], %17 {strides = array<i32>} : memref<64x128xf32, #tpu.memory_space<vmem>>, vector<64x128xf32>,
    } else {
    }
    return
  }
  func.func @transform_0(%arg0: i32, %arg1: i32) -> (i32, i32) {
    %c0_i32 = arith.constant 0 : i32
    return %arg0, %arg1 : i32, i32
  }
  func.func @transform_1(%arg0: i32, %arg1: i32) -> (i32, i32) {
    %c0_i32 = arith.constant 0 : i32
    %c0_i32_0 = arith.constant 0 : i32
    return %arg1, %c0_i32 : i32, i32
  }
  func.func @transform_2(%arg0: i32, %arg1: i32) -> (i32, i32) {
    %c0_i32 = arith.constant 0 : i32
    %c0_i32_0 = arith.constant 0 : i32
    return %arg0, %c0_i32 : i32, i32
  }
  func.func @transform_3(%arg0: i32, %arg1: i32) -> (i32, i32) {
    %c0_i32 = arith.constant 0 : i32
    %c0_i32_0 = arith.constant 0 : i32
    return %arg0, %c0_i32 : i32, i32
  }
}

</mosaic_0001>

<bundles_post_ra>
// kernel: tpu_custom_call.1
= control target key start
LH: loop header
LB: loop body
LE: loop exit
PB: predicated region body
PF: predicated region fallthrough
CT: control target
= control target key end

     0   :  { %8 = vsyncpa [#allocation4], 0  ;;  %s1353_s0 = inlined_call_operand.hbm [shape: bf16[128,128], index: 0, kind: input, shape index: {}]   ;;  %s1354_s1 = inlined_call_operand.hbm [shape: bf16[128,128], index: 1, kind: input, shape index: {}]   ;;  %s1355_s2 = inlined_call_operand.hbm [shape: bf16[128,128], index: 2, kind: input, shape index: {}]   ;;  %s1356_s3 = inlined_call_operand.hbm [shape: f32[128,128], index: 3, kind: output, shape index: {}]  }
   0x1   :  { %10 = vsyncpa [#allocation4 + $0x1], 0 }
   0x2   :  { %11 = vsyncpa [#allocation7], 0 }
   0x3   :  { %12 = vsyncpa [#allocation5], 0 }
   0x4   :  { %14 = vsyncpa [#allocation5 + $0x1], 0  ;;  %s1055_s12 = smov 0   ;;  %s1057_s13 = smov 0  }
   0x5   :  { %s1059_s14 = smov 0   ;;  %s1061_s15 = smov 0  }
   0x6   :  { %s1063_s16 = smov 0   ;;  %s1065_s17 = smov 0  }
   0x7 LB: > { %s32_s18 = sadd.s32 1, %s1021_s16  ;;  %s41_s19 = sadd.s32 1, %s1013_s14  ;;  %s1025_s17 = sphi %s1065_s17, %s20_s17   ;;  %s1021_s16 = sphi %s1063_s16, %s1381_s16   ;;  %s1017_s15 = sphi %s1061_s15, %s1380_s15   ;;  %s1013_s14 = sphi %s1059_s14, %s1379_s14   ;;  %s1009_s13 = sphi %s1057_s13, %s1378_s13   ;;  %s1005_s12 = sphi %s1055_s12, %s1377_s12  }
   0x8   : > { %p34_p0 = scmp.ge.s32.totalorder %s32_s18, 2  ;;  %p48_p1 = scmp.ne.s32.totalorder %s1013_s14, %s1009_s13 }
   0x9   : > { %p49_p2 = scmp.eq.s32.totalorder %s1025_s17, 0  ;;  %p779_p6 = scmp.lt.s32.totalorder %s1025_s17, 2 }
   0xa   : > { %s1383_s18 = smov (%p34_p0, %s32_s18), 0  ;;  %s172_s22 = sand.u32 1, %s1025_s17  }
   0xb   : > { %p1095_p3 = por %p49_p2, %p48_p1  ;;  %s36_s21 = ssub.s32 %s1021_s16, %s1383_s18 }
   0xc   : > { %p39_p5 = scmp.eq.s32.totalorder %s36_s21, 0  ;;  %s174_s23 = sand.u32 1, %s1013_s14  }
   0xd   : > { %s1108_s25 = sshll.u32 %s174_s23, 5  ;;  %s679_s26 = sshll.u32 %s1021_s16, 9 }
   0xe   : > { %s1106_s24 = scalar_select %p39_p5, %s1013_s14, %s41_s19  }
   0xf   : > { %s1114_s29 = scalar_lea.hbm %s1353_s0, %s679_s26  ;;  %s176_s30 = scalar_lea.vmem [#allocation3], %s1108_s25 }
  0x10   : > { %s184_s4 = sshll.u32 %s176_s30, 4  ;;  %p1121_p7 = pnand %p779_p6, %p1095_p3  ;;  %s1117_s4 = int_to_ptr.vmem [resolvable:$true] %s184_s4 }
  0x11   : > { %s1128_s8 = scalar_lea.hbm %s1355_s2, %s679_s26  ;;  %s1130_s9 = scalar_lea.sflag [#allocation4], %s172_s22 }
  0x12   : > { %s847_s10 = scalar_lea.hbm %s1114_s29, 512  ;;  %p849_p9 = pneg %p1121_p7 }
  0x13   : > { %p848_p8 = scmp.ne.s32.totalorder %s1114_s29, %s847_s10  ;;  %s852_s20 = scalar_lea.hbm %s1353_s0, 1024 }
  0x14   : > { %p853_p12 = scmp.lt.u32.totalorder %s1114_s29, %s1353_s0  ;;  %p854_p13 = scmp.lt.u32.totalorder %s852_s20, %s847_s10 }
  0x15   : > { %p850_p10 = pnand %p849_p9, %p848_p8  ;;  %p856_p2 = scmp.lt.u32.totalorder %s847_s10, %s1114_s29 }
  0x16   : > { %p855_p0 = por %p854_p13, %p853_p12 }
  0x17   : > { %p851_p11 = pneg %p850_p10 }
  0x18   : > { %p857_p3 = por %p856_p2, %p855_p0 }
  0x1a   : > { %p858_p5 = pnand %p857_p3, %p851_p11 }
  0x1c   : > { %861 = shalt.err (!%p858_p5)
}
  0x1d   : > { %s862_s22 = scalar_lea.vmem %s1117_s4, 512  ;;  %s1027_s26 = smov [#allocation3]  }
  0x1e   : > { %p863_p6 = scmp.ne.s32.totalorder %s1117_s4, %s862_s22  ;;  %s867_s27 = sshll.u32 %s1027_s26, 4  ;;  %s868_s27 = int_to_ptr.vmem [resolvable:$false] %s867_s27 }
  0x1f   : > { %s869_s28 = scalar_lea.vmem %s868_s27, 1024  ;;  %p870_p4 = scmp.lt.s32.totalorder %s1117_s4, %s868_s27 }
  0x20   : > { %p865_p8 = pnand %p863_p6, %p849_p9  ;;  %p871_p12 = scmp.lt.s32.totalorder %s869_s28, %s862_s22 }
  0x22   : > { %p866_p10 = pneg %p865_p8  ;;  %p872_p13 = por %p871_p12, %p870_p4 }
  0x24   : > { %p873_p0 = pnand %p872_p13, %p866_p10 }
  0x26   : > { %876 = shalt.err (!%p873_p0)
}
  0x27   : > { %s1028_s30 = smov 64   ;;  %s1029_s6 = smov 4  }
  0x28   : > { %770 = dma.hbm_to_vmem [thread:$0]  (!%p1121_p7), %s1114_s29, 512, %s1117_s4, %s1130_s9, %s1028_s30, %s1028_s30, %s1029_s6  }
  0x29   : > { %s198_s7 = scalar_lea.vmem [#allocation8], %s1108_s25  ;;  %s1163_s11 = sadd.s32 4294967295, %s1025_s17  }
  0x2a   : > { %s205_s10 = sshll.u32 %s198_s7, 4  ;;  %s647_s19 = sadd.s32 4294967294, %s1025_s17   ;;  %s1189_s10 = int_to_ptr.vmem [resolvable:$true] %s205_s10 }
  0x2b   : > { %p54_p4 = scmp.ne.s32.totalorder %s1009_s13, %s1005_s12  ;;  %p1357_p11 = scmp.eq.s32.totalorder %s1163_s11, 0 }
  0x2c   : > { %p130_p2 = scmp.eq.s32.totalorder %s1163_s11, 1  ;;  %p136_p3 = scmp.eq.s32.totalorder %s647_s19, 1 }
  0x2d   : > { %p648_p5 = scmp.ge.s32.totalorder %s1025_s17, 1  ;;  %p1173_p6 = por %p1357_p11, %p54_p4 }
  0x2e   : > { %p1180_p8 = por %p130_p2, %p48_p1  ;;  %p1184_p10 = por %p136_p3, %p54_p4 }
  0x2f   : > { %s1363_s29 = scalar_select %p1173_p6, 1, 0 }
  0x30   : > { %s1364_s25 = scalar_select %p1180_p8, 1, 0 }
  0x31   : > { %s1365_s4 = scalar_select %p1184_p10, 1, 0 }
  0x32   : > { %p143_p12 = scmp.lt.s32.totalorder %s1025_s17, 3  ;;  %s1030_s21 = smov [#allocation6]  }
  0x33   : > { %s1195_s23 = sshll.u32 %s1030_s21, 4  ;;  %s877_s22 = scalar_lea.hbm %s1128_s8, 512  ;;  %s159_s23 = int_to_ptr.vmem [resolvable:$true] %s1195_s23 }
  0x34   : > { %p1191_p13 = pnand %p648_p5, %p143_p12  ;;  %p878_p0 = scmp.ne.s32.totalorder %s1128_s8, %s877_s22 }
  0x35   : > { %s882_s28 = scalar_lea.hbm %s1355_s2, 1024  ;;  %p883_p3 = scmp.lt.u32.totalorder %s1128_s8, %s1355_s2 }
  0x36   : > { %s1366_s20 = scalar_select %p1191_p13, 1, 0 }
  0x37   : > { %p880_p4 = pnand %p878_p0, %p849_p9  ;;  %p884_p5 = scmp.lt.u32.totalorder %s882_s28, %s877_s22 }
  0x38   : > { %p886_p11 = scmp.lt.u32.totalorder %s877_s22, %s1128_s8 }
  0x39   : > { %p881_p2 = pneg %p880_p4  ;;  %p885_p12 = por %p884_p5, %p883_p3 }
  0x3b   : > { %p887_p10 = por %p886_p11, %p885_p12 }
  0x3d   : > { %p888_p8 = pnand %p887_p10, %p881_p2 }
  0x3f   : > { %891 = shalt.err (!%p888_p8)
}
  0x40   : > { %s892_s21 = scalar_lea.vmem %s1189_s10, 512  ;;  %s1031_s26 = smov [#allocation8]  }
  0x41   : > { %p893_p0 = scmp.ne.s32.totalorder %s1189_s10, %s892_s21  ;;  %s897_s27 = sshll.u32 %s1031_s26, 4  ;;  %s898_s27 = int_to_ptr.vmem [resolvable:$false] %s897_s27 }
  0x42   : > { %s899_s7 = scalar_lea.vmem %s898_s27, 1024  ;;  %p900_p6 = scmp.lt.s32.totalorder %s1189_s10, %s898_s27 }
  0x43   : > { %p895_p4 = pnand %p893_p0, %p849_p9  ;;  %p901_p3 = scmp.lt.s32.totalorder %s899_s7, %s892_s21 }
  0x45   : > { %p896_p1 = pneg %p895_p4  ;;  %p902_p5 = por %p901_p3, %p900_p6 }
  0x47   : > { %p903_p11 = pnand %p902_p5, %p896_p1 }
  0x49   : > { %906 = shalt.err (!%p903_p11)
}
  0x4a   : > { %773 = dma.hbm_to_vmem [thread:$0]  (!%p1121_p7), %s1128_s8, 512, %s1189_s10, %s1130_s9, %s1028_s30, %s1028_s30, %s1029_s6  }
  0x4b   : > { %p1367_p9 = scmp.eq.s32.totalorder %s1163_s11, 0  ;;  %p1368_p8 = pneg %p1191_p13 }
  0x4c   : > { %s907_s19 = scalar_lea.hbm %s1354_s1, 1024 }
  0x4d   : > { %p1232_p10 = pnand %p1368_p8, %p1367_p9  ;;  %p908_p6 = scmp.ne.s32.totalorder %s1354_s1, %s907_s19 }
  0x4e   : > { %p914_p12 = scmp.lt.u32.totalorder %s907_s19, %s1354_s1 }
  0x4f   : > { %p909_p1 = pneg %p1232_p10 }
  0x51   : > { %p910_p7 = pnand %p909_p1, %p908_p6 }
  0x53   : > { %p911_p2 = pneg %p910_p7 }
  0x55   : > { %p916_p0 = pnand %p914_p12, %p911_p2 }
  0x57   : > { %919 = shalt.err (!%p916_p0)
}
  0x58   : > { %s920_s10 = scalar_lea.vmem %s159_s23, 1024  ;;  %p928_p11 = scmp.lt.s32.totalorder %s159_s23, %s159_s23 }
  0x59   : > { %p921_p4 = scmp.ne.s32.totalorder %s159_s23, %s920_s10  ;;  %p929_p9 = scmp.lt.s32.totalorder %s920_s10, %s920_s10 }
  0x5b   : > { %p923_p3 = pnand %p921_p4, %p909_p1  ;;  %p930_p8 = por %p929_p9, %p928_p11 }
  0x5d   : > { %p924_p5 = pneg %p923_p3 }
  0x5f   : > { %p931_p13 = pnand %p930_p8, %p924_p5 }
  0x61   : > { %934 = shalt.err (!%p931_p13)
}
  0x62   : > { %766 = dma.hbm_to_vmem [thread:$0]  (!%p1232_p10), %s1354_s1, 1024, %s159_s23, [#allocation7], %s1028_s30, %s1028_s30, %s1029_s6  }
  0x63   : > { %p1370_p6 = scmp.ne.s32.totalorder %s1366_s20, 0 }
  0x64   : > { %s219_s28 = sand.u32 (!%p1370_p6), 1, %s1163_s11   ;;  %s1259_s5 = sand.u32 (!%p1370_p6), 1, %s1009_s13  }
  0x65   : > { %217 = sbr.rel (%p1370_p6) target bundleno = 382 (0x17e), region = 32  ;;  %s658_s19 = sshll.u32 (!%p1370_p6), %s1259_s5, 5 }
  0x66   : > { %s220_s21 = scalar_lea.sflag (!%p1370_p6), [#allocation4], %s219_s28  ;;  %s1262_s22 = scalar_lea.vmem (!%p1370_p6), [#allocation3], %s658_s19 }
  0x67   : > { %p1371_p13 = scmp.ne.s32.totalorder (!%p1370_p6), %s1363_s29, 0 }
  0x6c   : > { %988 = dma.done.wait (%p1371_p13), %s220_s21, 512  }
  0x6d   : > { %990 = vsyncadd (%p1371_p13), %s220_s21, 4294966784  ;;  %p1372_p10 = scmp.eq.s32.totalorder %s1163_s11, 0 }
  0x6f   : > { %992 = dma.done.wait (%p1372_p10), [#allocation7], 1024   ;;  %p1373_p1 = pmov %p1372_p10 }
  0x70   : > { %s1272_s30 = scalar_lea.vmem [#allocation8], %s658_s19 }
  0x71   : > { %994 = vsyncadd (%p1373_p1), [#allocation7], 4294966272 }
  0x72   : > { %996 = dma.done.wait (%p1371_p13), %s220_s21, 512  }
  0x73   : > { %998 = vsyncadd (%p1371_p13), %s220_s21, 4294966784  ;;  %v835_v0 = vld [vmem:[#allocation6] sm:$0xff]   ;;  %v836_v1 = vld [vmem:[#allocation6 + $0x8] sm:$0xff]   ;;  %s661_s6 = sshll.u32 %s1259_s5, 6  ;;  %s681_s20 = sshll.u32 %s1017_s15, 10 }
  0x74   : > { %713 = vmatprep.subr.bf16.mxu0 %v835_v0  ;;  %737 = vmatprep.subr.bf16.mxu1 %v835_v0  ;;  %v837_v2 = vld [vmem:[#allocation6 + $0x10] sm:$0xff]   ;;  %v838_v3 = vld [vmem:[#allocation6 + $0x18] sm:$0xff]   ;;  %v843_v4 = vld [vmem:[%s1262_s22] sm:$0xff]   ;;  %s1287_s11 = scalar_lea.vmem [#allocation9], %s661_s6  ;;  %s1298_s26 = scalar_lea.hbm %s1356_s3, %s681_s20 }
  0x75   : > { %714 = vmatpush3.bf16.msra.mxu0 %v835_v0  ;;  %745 = vmatpush3.bf16.msra.mxu1 %v835_v0  ;;  %v844_v5 = vld [vmem:[%s1262_s22 + $0x10] sm:$0xff]   ;;  %v839_v6 = vld [vmem:[#allocation6 + $0x20] sm:$0xff]   ;;  %v840_v7 = vld [vmem:[#allocation6 + $0x28] sm:$0xff]   ;;  %s531_s29 = sshll.u32 %s1287_s11, 4  ;;  %s518_s8 = scalar_lea.sflag [#allocation5], %s1259_s5  ;;  %s1291_s29 = int_to_ptr.vmem [resolvable:$true] %s531_s29 }
  0x76   : > { %715 = vmatprep.subr.bf16.mxu0 %v836_v1  ;;  %738 = vmatprep.subr.bf16.mxu1 %v836_v1  ;;  %v841_v8 = vld [vmem:[#allocation6 + $0x30] sm:$0xff]   ;;  %v842_v9 = vld [vmem:[#allocation6 + $0x38] sm:$0xff]   ;;  %v845_v10 = vld [vmem:[%s1262_s22 + $0x8] sm:$0xff]   ;;  %s935_s9 = scalar_lea.vmem %s1291_s29, 1024  ;;  %p1374_p2 = scmp.ne.s32.totalorder %s1364_s25, 0 }
  0x77   : > { %729 = vmatprep.mubr.bf16.mxu0 %v843_v4  ;;  %733 = vmatprep.mubr.bf16.mxu1 %v844_v5  ;;  %v846_v11 = vld [vmem:[%s1262_s22 + $0x18] sm:$0xff]   ;;  %v698_v12 = vld [vmem:[%s1272_s30 + $0x8] sm:$0xff]   ;;  %v683_v14 = vld [vmem:[%s1272_s30] sm:$0xff]   ;;  %p936_p7 = scmp.ne.s32.totalorder %s1291_s29, %s935_s9  ;;  %s1032_s10 = smov [#allocation9]  }
  0x78   : > { %v700_v13 = vld [vmem:[%s1272_s30 + $0x18] sm:$0xff]   ;;  %v699_v15 = vld [vmem:[%s1272_s30 + $0x10] sm:$0xff]   ;;  %v688_v16 = vunpack.c.l.bf16 %v698_v12  ;;  %v684_v18 = vunpack.c.l.bf16 %v683_v14  ;;  %v689_v20 = vunpack.c.h.bf16 %v698_v12  ;;  %v685_v24 = vunpack.c.h.bf16 %v683_v14  ;;  %s939_s27 = sshll.u32 %s1032_s10, 4  ;;  %s940_s27 = int_to_ptr.vmem [resolvable:$false] %s939_s27 }
  0x79   : > { %716 = vmatpush3.bf16.msra.mxu0 %v836_v1  ;;  %746 = vmatpush3.bf16.msra.mxu1 %v836_v1  ;;  %v696_v17 = vunpack.c.l.bf16 %v700_v13  ;;  %v692_v19 = vunpack.c.l.bf16 %v699_v15  ;;  %v697_v21 = vunpack.c.h.bf16 %v700_v13  ;;  %v693_v25 = vunpack.c.h.bf16 %v699_v15  ;;  %p937_p12 = pnand %p936_p7, %p1374_p2  ;;  %s941_s7 = scalar_lea.vmem %s940_s27, 2048 }
  0x7a   : > { %717 = vmatprep.subr.bf16.mxu0 %v837_v2  ;;  %739 = vmatprep.subr.bf16.mxu1 %v837_v2  ;;  %p942_p4 = scmp.lt.s32.totalorder %s1291_s29, %s940_s27  ;;  %p943_p3 = scmp.lt.s32.totalorder %s941_s7, %s935_s9 }
  0x7b   : > { %p938_p0 = pneg %p937_p12 }
  0x7c   : > { %p944_p5 = por %p943_p3, %p942_p4 }
  0x7d   : > { %718 = vmatpush3.bf16.msra.mxu0 %v837_v2  ;;  %747 = vmatpush3.bf16.msra.mxu1 %v837_v2 }
  0x7e   : > { %719 = vmatprep.subr.bf16.mxu0 %v838_v3  ;;  %740 = vmatprep.subr.bf16.mxu1 %v838_v3  ;;  %p945_p11 = pnand %p944_p5, %p938_p0 }
  0x81   : > { %720 = vmatpush3.bf16.msra.mxu0 %v838_v3  ;;  %748 = vmatpush3.bf16.msra.mxu1 %v838_v3 }
  0x82   : > { %721 = vmatprep.subr.bf16.mxu0 %v839_v6  ;;  %741 = vmatprep.subr.bf16.mxu1 %v839_v6 }
  0x85   : > { %722 = vmatpush3.bf16.msra.mxu0 %v839_v6  ;;  %749 = vmatpush3.bf16.msra.mxu1 %v839_v6 }
  0x86   : > { %723 = vmatprep.subr.bf16.mxu0 %v840_v7  ;;  %742 = vmatprep.subr.bf16.mxu1 %v840_v7 }
  0x89   : > { %724 = vmatpush3.bf16.msra.mxu0 %v840_v7  ;;  %750 = vmatpush3.bf16.msra.mxu1 %v840_v7 }
  0x8a   : > { %725 = vmatprep.subr.bf16.mxu0 %v841_v8  ;;  %743 = vmatprep.subr.bf16.mxu1 %v841_v8 }
  0x8d   : > { %726 = vmatpush3.bf16.msra.mxu0 %v841_v8  ;;  %751 = vmatpush3.bf16.msra.mxu1 %v841_v8 }
  0x8e   : > { %727 = vmatprep.subr.bf16.mxu0 %v842_v9  ;;  %744 = vmatprep.subr.bf16.mxu1 %v842_v9 }
  0x91   : > { %728 = vmatpush3.bf16.msra.mxu0 %v842_v9  ;;  %752 = vmatpush3.bf16.msra.mxu1 %v842_v9 }
  0x94   : > { %730 = vmatmul.mubr.bf16.vlgmr.msra.gmra.mrb[0].mxu0 %v845_v10  ;;  %734 = vmatmul.mubr.bf16.vlgmr.msra.gmra.mrb[0].mxu1 %v846_v11 }
 0x167   : > { %v731_v22 = vpop.f32.mrb[0].mxu0  ;;  %v735_v23 = vpop.f32.mrb[0].mxu1 }
 0x168   : > { %v495_v26 = vadd.f32 %v731_v22, %v688_v16  ;;  %v499_v27 = vadd.f32 %v735_v23, %v696_v17  ;;  %v419_v28 = vpop.f32.mrb[1].mxu0  ;;  %v435_v29 = vpop.f32.mrb[1].mxu1 }
 0x169   : > { %v493_v30 = vadd.f32 %v684_v18, %v419_v28  ;;  %v497_v31 = vadd.f32 %v692_v19, %v435_v29  ;;  %v732_v32 = vpop.f32.mrb[2].mxu0  ;;  %v736_v33 = vpop.f32.mrb[2].mxu1 }
 0x16a   : > { %v503_v34 = vmax.f32 %v495_v26, 0.0  ;;  %v507_v35 = vmax.f32 %v499_v27, 0.0  ;;  %v496_v36 = vadd.f32 %v732_v32, %v689_v20  ;;  %v500_v37 = vadd.f32 %v736_v33, %v697_v21  ;;  %v422_v38 = vpop.f32.mrb[3].mxu0  ;;  %v438_v39 = vpop.f32.mrb[3].mxu1 }
 0x16b   : > { %v501_v40 = vmax.f32 %v493_v30, 0.0  ;;  %v505_v41 = vmax.f32 %v497_v31, 0.0  ;;  %v494_v42 = vadd.f32 %v685_v24, %v422_v38  ;;  %v498_v43 = vadd.f32 %v693_v25, %v438_v39 }
 0x16c   : > { %511 = vst [vmem:[%s1287_s11 + $0x10] sm:$0xff] %v503_v34  ;;  %515 = vst [vmem:[%s1287_s11 + $0x30] sm:$0xff] %v507_v35  ;;  %v504_v44 = vmax.f32 %v496_v36, 0.0  ;;  %v508_v45 = vmax.f32 %v500_v37, 0.0 }
 0x16d   : > { %509 = vst [vmem:[%s1287_s11] sm:$0xff] %v501_v40  ;;  %513 = vst [vmem:[%s1287_s11 + $0x20] sm:$0xff] %v505_v41  ;;  %v502_v46 = vmax.f32 %v494_v42, 0.0  ;;  %v506_v47 = vmax.f32 %v498_v43, 0.0 }
 0x16e   : > { %512 = vst [vmem:[%s1287_s11 + $0x18] sm:$0xff] %v504_v44  ;;  %516 = vst [vmem:[%s1287_s11 + $0x38] sm:$0xff] %v508_v45 }
 0x16f   : > { %510 = vst [vmem:[%s1287_s11 + $0x8] sm:$0xff] %v502_v46  ;;  %514 = vst [vmem:[%s1287_s11 + $0x28] sm:$0xff] %v506_v47 }
 0x170   : > { %948 = shalt.err (!%p945_p11)
}
 0x171   : > { %s949_s28 = scalar_lea.hbm %s1298_s26, 1024  ;;  %s953_s22 = scalar_lea.hbm %s1356_s3, 2048 }
 0x172   : > { %p950_p9 = scmp.ne.s32.totalorder %s1298_s26, %s949_s28  ;;  %p954_p13 = scmp.lt.u32.totalorder %s1298_s26, %s1356_s3 }
 0x173   : > { %p955_p10 = scmp.lt.u32.totalorder %s953_s22, %s949_s28  ;;  %p957_p7 = scmp.lt.u32.totalorder %s949_s28, %s1298_s26 }
 0x174   : > { %p951_p8 = pnand %p950_p9, %p1374_p2 }
 0x175   : > { %p956_p1 = por %p955_p10, %p954_p13 }
 0x176   : > { %p952_p6 = pneg %p951_p8 }
 0x177   : > { %p958_p12 = por %p957_p7, %p956_p1 }
 0x179   : > { %p959_p0 = pnand %p958_p12, %p952_p6 }
 0x17b   : > { %962 = shalt.err (!%p959_p0)
}
 0x17c   : > { %s1033_s11 = smov 128   ;;  %s1034_s20 = smov 8  }
 0x17d   : > { %761 = dma.vmem_to_hbm [thread:$0]  (%p1374_p2), %s1291_s29, 1024, %s1298_s26, %s518_s8, %s1033_s11, %s1033_s11, %s1034_s20  }
 0x17e PF: > { %s546_s15 = sand.u32 1, %s1005_s12   ;;  %p1375_p4 = scmp.ne.s32.totalorder %s1365_s4, 0 }
 0x17f   : > { %p1376_p3 = scmp.ge.s32.totalorder %s1025_s17, 2  ;;  %s547_s23 = scalar_lea.sflag [#allocation5], %s546_s15 }
 0x181   : > { %p775_p5 = pnand %p1376_p3, %p1375_p4 }
 0x183   : > { %1000 = dma.done.wait (!%p775_p5), %s547_s23, 1024  }
 0x184   : > { %1002 = vsyncadd (!%p775_p5), %s547_s23, 4294966272  ;;  %s20_s17 = sadd.s32 1, %s1025_s17   ;;  %s1377_s12 = smov %s1009_s13 }
 0x185   : > { %p17_p11 = scmp.ge.s32.totalorder %s20_s17, 4   ;;  %s1378_s13 = smov %s1013_s14 }
 0x186   : > { %s1379_s14 = smov %s1106_s24  ;;  %s1380_s15 = smov %s1021_s16 }
 0x187   : > { %s1381_s16 = smov %s1383_s18  ;;  %19 = sbr.rel (!%p17_p11) target bundleno = 7 (0x7), region = 101 }
 0x18e   :  { %552 = vsyncpa [#allocation4], 1 }
 0x18f   :  { %554 = vsyncpa [#allocation4 + $0x1], 1 }
 0x190   :  { %555 = vsyncpa [#allocation7], 1 }
 0x191   :  { %556 = vsyncpa [#allocation5], 1 }
 0x192   :  { %558 = vsyncpa [#allocation5 + $0x1], 1 }

// kernel: tpu_custom_call.1
= control target key start
LH: loop header
LB: loop body
LE: loop exit
PB: predicated region body
PF: predicated region fallthrough
CT: control target
= control target key end

     0   :  { %8 = vsyncpa [#allocation4], 0  ;;  %s1353_s0 = inlined_call_operand.hbm [shape: bf16[128,128], index: 0, kind: input, shape index: {}]   ;;  %s1354_s1 = inlined_call_operand.hbm [shape: bf16[128,128], index: 1, kind: input, shape index: {}]   ;;  %s1355_s2 = inlined_call_operand.hbm [shape: bf16[128,128], index: 2, kind: input, shape index: {}]   ;;  %s1356_s3 = inlined_call_operand.hbm [shape: f32[128,128], index: 3, kind: output, shape index: {}]  }
   0x1   :  { %10 = vsyncpa [#allocation4 + $0x1], 0 }
   0x2   :  { %11 = vsyncpa [#allocation7], 0 }
   0x3   :  { %12 = vsyncpa [#allocation5], 0 }
   0x4   :  { %14 = vsyncpa [#allocation5 + $0x1], 0  ;;  %s1055_s12 = smov 0   ;;  %s1057_s13 = smov 0  }
   0x5   :  { %s1059_s14 = smov 0   ;;  %s1061_s15 = smov 0  }
   0x6   :  { %s1063_s16 = smov 0   ;;  %s1065_s17 = smov 0  }
   0x7 LB: > { %s32_s18 = sadd.s32 1, %s1021_s16  ;;  %s41_s19 = sadd.s32 1, %s1013_s14  ;;  %s1025_s17 = sphi %s1065_s17, %s20_s17   ;;  %s1021_s16 = sphi %s1063_s16, %s1381_s16   ;;  %s1017_s15 = sphi %s1061_s15, %s1380_s15   ;;  %s1013_s14 = sphi %s1059_s14, %s1379_s14   ;;  %s1009_s13 = sphi %s1057_s13, %s1378_s13   ;;  %s1005_s12 = sphi %s1055_s12, %s1377_s12  }
   0x8   : > { %p34_p0 = scmp.ge.s32.totalorder %s32_s18, 2  ;;  %p48_p1 = scmp.ne.s32.totalorder %s1013_s14, %s1009_s13 }
   0x9   : > { %p49_p2 = scmp.eq.s32.totalorder %s1025_s17, 0  ;;  %p779_p6 = scmp.lt.s32.totalorder %s1025_s17, 2 }
   0xa   : > { %s1383_s18 = smov (%p34_p0, %s32_s18), 0  ;;  %s172_s22 = sand.u32 1, %s1025_s17  }
   0xb   : > { %p1095_p3 = por %p49_p2, %p48_p1  ;;  %s36_s21 = ssub.s32 %s1021_s16, %s1383_s18 }
   0xc   : > { %p39_p5 = scmp.eq.s32.totalorder %s36_s21, 0  ;;  %s174_s23 = sand.u32 1, %s1013_s14  }
   0xd   : > { %s1108_s25 = sshll.u32 %s174_s23, 5  ;;  %s679_s26 = sshll.u32 %s1021_s16, 9 }
   0xe   : > { %s1106_s24 = scalar_select %p39_p5, %s1013_s14, %s41_s19  }
   0xf   : > { %s1114_s29 = scalar_lea.hbm %s1353_s0, %s679_s26  ;;  %s176_s30 = scalar_lea.vmem [#allocation3], %s1108_s25 }
  0x10   : > { %s184_s4 = sshll.u32 %s176_s30, 4  ;;  %p1121_p7 = pnand %p779_p6, %p1095_p3  ;;  %s1117_s4 = int_to_ptr.vmem [resolvable:$true] %s184_s4 }
  0x11   : > { %s1128_s8 = scalar_lea.hbm %s1355_s2, %s679_s26  ;;  %s1130_s9 = scalar_lea.sflag [#allocation4], %s172_s22 }
  0x12   : > { %s847_s10 = scalar_lea.hbm %s1114_s29, 512  ;;  %p849_p9 = pneg %p1121_p7 }
  0x13   : > { %p848_p8 = scmp.ne.s32.totalorder %s1114_s29, %s847_s10  ;;  %s852_s20 = scalar_lea.hbm %s1353_s0, 1024 }
  0x14   : > { %p853_p12 = scmp.lt.u32.totalorder %s1114_s29, %s1353_s0  ;;  %p854_p13 = scmp.lt.u32.totalorder %s852_s20, %s847_s10 }
  0x15   : > { %p850_p10 = pnand %p849_p9, %p848_p8  ;;  %p856_p2 = scmp.lt.u32.totalorder %s847_s10, %s1114_s29 }
  0x16   : > { %p855_p0 = por %p854_p13, %p853_p12 }
  0x17   : > { %p851_p11 = pneg %p850_p10 }
  0x18   : > { %p857_p3 = por %p856_p2, %p855_p0 }
  0x1a   : > { %p858_p5 = pnand %p857_p3, %p851_p11 }
  0x1c   : > { %861 = shalt.err (!%p858_p5)
}
  0x1d   : > { %s862_s22 = scalar_lea.vmem %s1117_s4, 512  ;;  %s1027_s26 = smov [#allocation3]  }
  0x1e   : > { %p863_p6 = scmp.ne.s32.totalorder %s1117_s4, %s862_s22  ;;  %s867_s27 = sshll.u32 %s1027_s26, 4  ;;  %s868_s27 = int_to_ptr.vmem [resolvable:$false] %s867_s27 }
  0x1f   : > { %s869_s28 = scalar_lea.vmem %s868_s27, 1024  ;;  %p870_p4 = scmp.lt.s32.totalorder %s1117_s4, %s868_s27 }
  0x20   : > { %p865_p8 = pnand %p863_p6, %p849_p9  ;;  %p871_p12 = scmp.lt.s32.totalorder %s869_s28, %s862_s22 }
  0x22   : > { %p866_p10 = pneg %p865_p8  ;;  %p872_p13 = por %p871_p12, %p870_p4 }
  0x24   : > { %p873_p0 = pnand %p872_p13, %p866_p10 }
  0x26   : > { %876 = shalt.err (!%p873_p0)
}
  0x27   : > { %s1028_s30 = smov 64   ;;  %s1029_s6 = smov 4  }
  0x28   : > { %770 = dma.hbm_to_vmem [thread:$0]  (!%p1121_p7), %s1114_s29, 512, %s1117_s4, %s1130_s9, %s1028_s30, %s1028_s30, %s1029_s6  }
  0x29   : > { %s198_s7 = scalar_lea.vmem [#allocation8], %s1108_s25  ;;  %s1163_s11 = sadd.s32 4294967295, %s1025_s17  }
  0x2a   : > { %s205_s10 = sshll.u32 %s198_s7, 4  ;;  %s647_s19 = sadd.s32 4294967294, %s1025_s17   ;;  %s1189_s10 = int_to_ptr.vmem [resolvable:$true] %s205_s10 }
  0x2b   : > { %p54_p4 = scmp.ne.s32.totalorder %s1009_s13, %s1005_s12  ;;  %p1357_p11 = scmp.eq.s32.totalorder %s1163_s11, 0 }
  0x2c   : > { %p130_p2 = scmp.eq.s32.totalorder %s1163_s11, 1  ;;  %p136_p3 = scmp.eq.s32.totalorder %s647_s19, 1 }
  0x2d   : > { %p648_p5 = scmp.ge.s32.totalorder %s1025_s17, 1  ;;  %p1173_p6 = por %p1357_p11, %p54_p4 }
  0x2e   : > { %p1180_p8 = por %p130_p2, %p48_p1  ;;  %p1184_p10 = por %p136_p3, %p54_p4 }
  0x2f   : > { %s1363_s29 = scalar_select %p1173_p6, 1, 0 }
  0x30   : > { %s1364_s25 = scalar_select %p1180_p8, 1, 0 }
  0x31   : > { %s1365_s4 = scalar_select %p1184_p10, 1, 0 }
  0x32   : > { %p143_p12 = scmp.lt.s32.totalorder %s1025_s17, 3  ;;  %s1030_s21 = smov [#allocation6]  }
  0x33   : > { %s1195_s23 = sshll.u32 %s1030_s21, 4  ;;  %s877_s22 = scalar_lea.hbm %s1128_s8, 512  ;;  %s159_s23 = int_to_ptr.vmem [resolvable:$true] %s1195_s23 }
  0x34   : > { %p1191_p13 = pnand %p648_p5, %p143_p12  ;;  %p878_p0 = scmp.ne.s32.totalorder %s1128_s8, %s877_s22 }
  0x35   : > { %s882_s28 = scalar_lea.hbm %s1355_s2, 1024  ;;  %p883_p3 = scmp.lt.u32.totalorder %s1128_s8, %s1355_s2 }
  0x36   : > { %s1366_s20 = scalar_select %p1191_p13, 1, 0 }
  0x37   : > { %p880_p4 = pnand %p878_p0, %p849_p9  ;;  %p884_p5 = scmp.lt.u32.totalorder %s882_s28, %s877_s22 }
  0x38   : > { %p886_p11 = scmp.lt.u32.totalorder %s877_s22, %s1128_s8 }
  0x39   : > { %p881_p2 = pneg %p880_p4  ;;  %p885_p12 = por %p884_p5, %p883_p3 }
  0x3b   : > { %p887_p10 = por %p886_p11, %p885_p12 }
  0x3d   : > { %p888_p8 = pnand %p887_p10, %p881_p2 }
  0x3f   : > { %891 = shalt.err (!%p888_p8)
}
  0x40   : > { %s892_s21 = scalar_lea.vmem %s1189_s10, 512  ;;  %s1031_s26 = smov [#allocation8]  }
  0x41   : > { %p893_p0 = scmp.ne.s32.totalorder %s1189_s10, %s892_s21  ;;  %s897_s27 = sshll.u32 %s1031_s26, 4  ;;  %s898_s27 = int_to_ptr.vmem [resolvable:$false] %s897_s27 }
  0x42   : > { %s899_s7 = scalar_lea.vmem %s898_s27, 1024  ;;  %p900_p6 = scmp.lt.s32.totalorder %s1189_s10, %s898_s27 }
  0x43   : > { %p895_p4 = pnand %p893_p0, %p849_p9  ;;  %p901_p3 = scmp.lt.s32.totalorder %s899_s7, %s892_s21 }
  0x45   : > { %p896_p1 = pneg %p895_p4  ;;  %p902_p5 = por %p901_p3, %p900_p6 }
  0x47   : > { %p903_p11 = pnand %p902_p5, %p896_p1 }
  0x49   : > { %906 = shalt.err (!%p903_p11)
}
  0x4a   : > { %773 = dma.hbm_to_vmem [thread:$0]  (!%p1121_p7), %s1128_s8, 512, %s1189_s10, %s1130_s9, %s1028_s30, %s1028_s30, %s1029_s6  }
  0x4b   : > { %p1367_p9 = scmp.eq.s32.totalorder %s1163_s11, 0  ;;  %p1368_p8 = pneg %p1191_p13 }
  0x4c   : > { %s907_s19 = scalar_lea.hbm %s1354_s1, 1024 }
  0x4d   : > { %p1232_p10 = pnand %p1368_p8, %p1367_p9  ;;  %p908_p6 = scmp.ne.s32.totalorder %s1354_s1, %s907_s19 }
  0x4e   : > { %p914_p12 = scmp.lt.u32.totalorder %s907_s19, %s1354_s1 }
  0x4f   : > { %p909_p1 = pneg %p1232_p10 }
  0x51   : > { %p910_p7 = pnand %p909_p1, %p908_p6 }
  0x53   : > { %p911_p2 = pneg %p910_p7 }
  0x55   : > { %p916_p0 = pnand %p914_p12, %p911_p2 }
  0x57   : > { %919 = shalt.err (!%p916_p0)
}
  0x58   : > { %s920_s10 = scalar_lea.vmem %s159_s23, 1024  ;;  %p928_p11 = scmp.lt.s32.totalorder %s159_s23, %s159_s23 }
  0x59   : > { %p921_p4 = scmp.ne.s32.totalorder %s159_s23, %s920_s10  ;;  %p929_p9 = scmp.lt.s32.totalorder %s920_s10, %s920_s10 }
  0x5b   : > { %p923_p3 = pnand %p921_p4, %p909_p1  ;;  %p930_p8 = por %p929_p9, %p928_p11 }
  0x5d   : > { %p924_p5 = pneg %p923_p3 }
  0x5f   : > { %p931_p13 = pnand %p930_p8, %p924_p5 }
  0x61   : > { %934 = shalt.err (!%p931_p13)
}
  0x62   : > { %766 = dma.hbm_to_vmem [thread:$0]  (!%p1232_p10), %s1354_s1, 1024, %s159_s23, [#allocation7], %s1028_s30, %s1028_s30, %s1029_s6  }
  0x63   : > { %p1370_p6 = scmp.ne.s32.totalorder %s1366_s20, 0 }
  0x64   : > { %s219_s28 = sand.u32 (!%p1370_p6), 1, %s1163_s11   ;;  %s1259_s5 = sand.u32 (!%p1370_p6), 1, %s1009_s13  }
  0x65   : > { %217 = sbr.rel (%p1370_p6) target bundleno = 382 (0x17e), region = 32  ;;  %s658_s19 = sshll.u32 (!%p1370_p6), %s1259_s5, 5 }
  0x66   : > { %s220_s21 = scalar_lea.sflag (!%p1370_p6), [#allocation4], %s219_s28  ;;  %s1262_s22 = scalar_lea.vmem (!%p1370_p6), [#allocation3], %s658_s19 }
  0x67   : > { %p1371_p13 = scmp.ne.s32.totalorder (!%p1370_p6), %s1363_s29, 0 }
  0x6c   : > { %988 = dma.done.wait (%p1371_p13), %s220_s21, 512  }
  0x6d   : > { %990 = vsyncadd (%p1371_p13), %s220_s21, 4294966784  ;;  %p1372_p10 = scmp.eq.s32.totalorder %s1163_s11, 0 }
  0x6f   : > { %992 = dma.done.wait (%p1372_p10), [#allocation7], 1024   ;;  %p1373_p1 = pmov %p1372_p10 }
  0x70   : > { %s1272_s30 = scalar_lea.vmem [#allocation8], %s658_s19 }
  0x71   : > { %994 = vsyncadd (%p1373_p1), [#allocation7], 4294966272 }
  0x72   : > { %996 = dma.done.wait (%p1371_p13), %s220_s21, 512  }
  0x73   : > { %998 = vsyncadd (%p1371_p13), %s220_s21, 4294966784  ;;  %v835_v0 = vld [vmem:[#allocation6] sm:$0xff]   ;;  %v836_v1 = vld [vmem:[#allocation6 + $0x8] sm:$0xff]   ;;  %s661_s6 = sshll.u32 %s1259_s5, 6  ;;  %s681_s20 = sshll.u32 %s1017_s15, 10 }
  0x74   : > { %713 = vmatprep.subr.bf16.mxu0 %v835_v0  ;;  %737 = vmatprep.subr.bf16.mxu1 %v835_v0  ;;  %v837_v2 = vld [vmem:[#allocation6 + $0x10] sm:$0xff]   ;;  %v838_v3 = vld [vmem:[#allocation6 + $0x18] sm:$0xff]   ;;  %v843_v4 = vld [vmem:[%s1262_s22] sm:$0xff]   ;;  %s1287_s11 = scalar_lea.vmem [#allocation9], %s661_s6  ;;  %s1298_s26 = scalar_lea.hbm %s1356_s3, %s681_s20 }
  0x75   : > { %714 = vmatpush3.bf16.msra.mxu0 %v835_v0  ;;  %745 = vmatpush3.bf16.msra.mxu1 %v835_v0  ;;  %v844_v5 = vld [vmem:[%s1262_s22 + $0x10] sm:$0xff]   ;;  %v839_v6 = vld [vmem:[#allocation6 + $0x20] sm:$0xff]   ;;  %v840_v7 = vld [vmem:[#allocation6 + $0x28] sm:$0xff]   ;;  %s531_s29 = sshll.u32 %s1287_s11, 4  ;;  %s518_s8 = scalar_lea.sflag [#allocation5], %s1259_s5  ;;  %s1291_s29 = int_to_ptr.vmem [resolvable:$true] %s531_s29 }
  0x76   : > { %715 = vmatprep.subr.bf16.mxu0 %v836_v1  ;;  %738 = vmatprep.subr.bf16.mxu1 %v836_v1  ;;  %v841_v8 = vld [vmem:[#allocation6 + $0x30] sm:$0xff]   ;;  %v842_v9 = vld [vmem:[#allocation6 + $0x38] sm:$0xff]   ;;  %v845_v10 = vld [vmem:[%s1262_s22 + $0x8] sm:$0xff]   ;;  %s935_s9 = scalar_lea.vmem %s1291_s29, 1024  ;;  %p1374_p2 = scmp.ne.s32.totalorder %s1364_s25, 0 }
  0x77   : > { %729 = vmatprep.mubr.bf16.mxu0 %v843_v4  ;;  %733 = vmatprep.mubr.bf16.mxu1 %v844_v5  ;;  %v846_v11 = vld [vmem:[%s1262_s22 + $0x18] sm:$0xff]   ;;  %v698_v12 = vld [vmem:[%s1272_s30 + $0x8] sm:$0xff]   ;;  %v683_v14 = vld [vmem:[%s1272_s30] sm:$0xff]   ;;  %p936_p7 = scmp.ne.s32.totalorder %s1291_s29, %s935_s9  ;;  %s1032_s10 = smov [#allocation9]  }
  0x78   : > { %v700_v13 = vld [vmem:[%s1272_s30 + $0x18] sm:$0xff]   ;;  %v699_v15 = vld [vmem:[%s1272_s30 + $0x10] sm:$0xff]   ;;  %v688_v16 = vunpack.c.l.bf16 %v698_v12  ;;  %v684_v18 = vunpack.c.l.bf16 %v683_v14  ;;  %v689_v20 = vunpack.c.h.bf16 %v698_v12  ;;  %v685_v24 = vunpack.c.h.bf16 %v683_v14  ;;  %s939_s27 = sshll.u32 %s1032_s10, 4  ;;  %s940_s27 = int_to_ptr.vmem [resolvable:$false] %s939_s27 }
  0x79   : > { %716 = vmatpush3.bf16.msra.mxu0 %v836_v1  ;;  %746 = vmatpush3.bf16.msra.mxu1 %v836_v1  ;;  %v696_v17 = vunpack.c.l.bf16 %v700_v13  ;;  %v692_v19 = vunpack.c.l.bf16 %v699_v15  ;;  %v697_v21 = vunpack.c.h.bf16 %v700_v13  ;;  %v693_v25 = vunpack.c.h.bf16 %v699_v15  ;;  %p937_p12 = pnand %p936_p7, %p1374_p2  ;;  %s941_s7 = scalar_lea.vmem %s940_s27, 2048 }
  0x7a   : > { %717 = vmatprep.subr.bf16.mxu0 %v837_v2  ;;  %739 = vmatprep.subr.bf16.mxu1 %v837_v2  ;;  %p942_p4 = scmp.lt.s32.totalorder %s1291_s29, %s940_s27  ;;  %p943_p3 = scmp.lt.s32.totalorder %s941_s7, %s935_s9 }
  0x7b   : > { %p938_p0 = pneg %p937_p12 }
  0x7c   : > { %p944_p5 = por %p943_p3, %p942_p4 }
  0x7d   : > { %718 = vmatpush3.bf16.msra.mxu0 %v837_v2  ;;  %747 = vmatpush3.bf16.msra.mxu1 %v837_v2 }
  0x7e   : > { %719 = vmatprep.subr.bf16.mxu0 %v838_v3  ;;  %740 = vmatprep.subr.bf16.mxu1 %v838_v3  ;;  %p945_p11 = pnand %p944_p5, %p938_p0 }
  0x81   : > { %720 = vmatpush3.bf16.msra.mxu0 %v838_v3  ;;  %748 = vmatpush3.bf16.msra.mxu1 %v838_v3 }
  0x82   : > { %721 = vmatprep.subr.bf16.mxu0 %v839_v6  ;;  %741 = vmatprep.subr.bf16.mxu1 %v839_v6 }
  0x85   : > { %722 = vmatpush3.bf16.msra.mxu0 %v839_v6  ;;  %749 = vmatpush3.bf16.msra.mxu1 %v839_v6 }
  0x86   : > { %723 = vmatprep.subr.bf16.mxu0 %v840_v7  ;;  %742 = vmatprep.subr.bf16.mxu1 %v840_v7 }
  0x89   : > { %724 = vmatpush3.bf16.msra.mxu0 %v840_v7  ;;  %750 = vmatpush3.bf16.msra.mxu1 %v840_v7 }
  0x8a   : > { %725 = vmatprep.subr.bf16.mxu0 %v841_v8  ;;  %743 = vmatprep.subr.bf16.mxu1 %v841_v8 }
  0x8d   : > { %726 = vmatpush3.bf16.msra.mxu0 %v841_v8  ;;  %751 = vmatpush3.bf16.msra.mxu1 %v841_v8 }
  0x8e   : > { %727 = vmatprep.subr.bf16.mxu0 %v842_v9  ;;  %744 = vmatprep.subr.bf16.mxu1 %v842_v9 }
  0x91   : > { %728 = vmatpush3.bf16.msra.mxu0 %v842_v9  ;;  %752 = vmatpush3.bf16.msra.mxu1 %v842_v9 }
  0x94   : > { %730 = vmatmul.mubr.bf16.vlgmr.msra.gmra.mrb[0].mxu0 %v845_v10  ;;  %734 = vmatmul.mubr.bf16.vlgmr.msra.gmra.mrb[0].mxu1 %v846_v11 }
 0x167   : > { %v731_v22 = vpop.f32.mrb[0].mxu0  ;;  %v735_v23 = vpop.f32.mrb[0].mxu1 }
 0x168   : > { %v495_v26 = vadd.f32 %v731_v22, %v688_v16  ;;  %v499_v27 = vadd.f32 %v735_v23, %v696_v17  ;;  %v419_v28 = vpop.f32.mrb[1].mxu0  ;;  %v435_v29 = vpop.f32.mrb[1].mxu1 }
 0x169   : > { %v493_v30 = vadd.f32 %v684_v18, %v419_v28  ;;  %v497_v31 = vadd.f32 %v692_v19, %v435_v29  ;;  %v732_v32 = vpop.f32.mrb[2].mxu0  ;;  %v736_v33 = vpop.f32.mrb[2].mxu1 }
 0x16a   : > { %v503_v34 = vmax.f32 %v495_v26, 0.0  ;;  %v507_v35 = vmax.f32 %v499_v27, 0.0  ;;  %v496_v36 = vadd.f32 %v732_v32, %v689_v20  ;;  %v500_v37 = vadd.f32 %v736_v33, %v697_v21  ;;  %v422_v38 = vpop.f32.mrb[3].mxu0  ;;  %v438_v39 = vpop.f32.mrb[3].mxu1 }
 0x16b   : > { %v501_v40 = vmax.f32 %v493_v30, 0.0  ;;  %v505_v41 = vmax.f32 %v497_v31, 0.0  ;;  %v494_v42 = vadd.f32 %v685_v24, %v422_v38  ;;  %v498_v43 = vadd.f32 %v693_v25, %v438_v39 }
 0x16c   : > { %511 = vst [vmem:[%s1287_s11 + $0x10] sm:$0xff] %v503_v34  ;;  %515 = vst [vmem:[%s1287_s11 + $0x30] sm:$0xff] %v507_v35  ;;  %v504_v44 = vmax.f32 %v496_v36, 0.0  ;;  %v508_v45 = vmax.f32 %v500_v37, 0.0 }
 0x16d   : > { %509 = vst [vmem:[%s1287_s11] sm:$0xff] %v501_v40  ;;  %513 = vst [vmem:[%s1287_s11 + $0x20] sm:$0xff] %v505_v41  ;;  %v502_v46 = vmax.f32 %v494_v42, 0.0  ;;  %v506_v47 = vmax.f32 %v498_v43, 0.0 }
 0x16e   : > { %512 = vst [vmem:[%s1287_s11 + $0x18] sm:$0xff] %v504_v44  ;;  %516 = vst [vmem:[%s1287_s11 + $0x38] sm:$0xff] %v508_v45 }
 0x16f   : > { %510 = vst [vmem:[%s1287_s11 + $0x8] sm:$0xff] %v502_v46  ;;  %514 = vst [vmem:[%s1287_s11 + $0x28] sm:$0xff] %v506_v47 }
 0x170   : > { %948 = shalt.err (!%p945_p11)
}
 0x171   : > { %s949_s28 = scalar_lea.hbm %s1298_s26, 1024  ;;  %s953_s22 = scalar_lea.hbm %s1356_s3, 2048 }
 0x172   : > { %p950_p9 = scmp.ne.s32.totalorder %s1298_s26, %s949_s28  ;;  %p954_p13 = scmp.lt.u32.totalorder %s1298_s26, %s1356_s3 }
 0x173   : > { %p955_p10 = scmp.lt.u32.totalorder %s953_s22, %s949_s28  ;;  %p957_p7 = scmp.lt.u32.totalorder %s949_s28, %s1298_s26 }
 0x174   : > { %p951_p8 = pnand %p950_p9, %p1374_p2 }
 0x175   : > { %p956_p1 = por %p955_p10, %p954_p13 }
 0x176   : > { %p952_p6 = pneg %p951_p8 }
 0x177   : > { %p958_p12 = por %p957_p7, %p956_p1 }
 0x179   : > { %p959_p0 = pnand %p958_p12, %p952_p6 }
 0x17b   : > { %962 = shalt.err (!%p959_p0)
}
 0x17c   : > { %s1033_s11 = smov 128   ;;  %s1034_s20 = smov 8  }
 0x17d   : > { %761 = dma.vmem_to_hbm [thread:$0]  (%p1374_p2), %s1291_s29, 1024, %s1298_s26, %s518_s8, %s1033_s11, %s1033_s11, %s1034_s20  }
 0x17e PF: > { %s546_s15 = sand.u32 1, %s1005_s12   ;;  %p1375_p4 = scmp.ne.s32.totalorder %s1365_s4, 0 }
 0x17f   : > { %p1376_p3 = scmp.ge.s32.totalorder %s1025_s17, 2  ;;  %s547_s23 = scalar_lea.sflag [#allocation5], %s546_s15 }
 0x181   : > { %p775_p5 = pnand %p1376_p3, %p1375_p4 }
 0x183   : > { %1000 = dma.done.wait (!%p775_p5), %s547_s23, 1024  }
 0x184   : > { %1002 = vsyncadd (!%p775_p5), %s547_s23, 4294966272  ;;  %s20_s17 = sadd.s32 1, %s1025_s17   ;;  %s1377_s12 = smov %s1009_s13 }
 0x185   : > { %p17_p11 = scmp.ge.s32.totalorder %s20_s17, 4   ;;  %s1378_s13 = smov %s1013_s14 }
 0x186   : > { %s1379_s14 = smov %s1106_s24  ;;  %s1380_s15 = smov %s1021_s16 }
 0x187   : > { %s1381_s16 = smov %s1383_s18  ;;  %19 = sbr.rel (!%p17_p11) target bundleno = 7 (0x7), region = 101 }
 0x18e   :  { %552 = vsyncpa [#allocation4], 1 }
 0x18f   :  { %554 = vsyncpa [#allocation4 + $0x1], 1 }
 0x190   :  { %555 = vsyncpa [#allocation7], 1 }
 0x191   :  { %556 = vsyncpa [#allocation5], 1 }
 0x192   :  { %558 = vsyncpa [#allocation5 + $0x1], 1 }

</bundles_post_ra>
